<compile_context>
chip_gen: v7x
topology: tpu7x:2x2x1
jax: 0.10.0
libtpu: 0.0.40
codegen_flags: <defaults>
</compile_context>

<pallas_src>
import jax
import jax.numpy as jnp
from jax.experimental import pallas as pl
from jax.experimental.pallas import tpu as pltpu


def _round_up(x, m):
    return ((x + m - 1) // m) * m


def _largest_aligned_divisor(dim_pad, align, cap):
    """Largest multiple of `align` that divides dim_pad and is <= cap."""
    cap = max(align, min(dim_pad, (cap // align) * align))
    for t in range(cap, align - 1, -align):
        if dim_pad % t == 0:
            return t
    return align


def _linear_kernel(x_ref, w_ref, b_ref, o_ref):
    # Output tile is resident across the (last, "arbitrary") reduction axis, so we
    # accumulate into it directly; the bias is the k==0 initializer (added once).
    @pl.when(pl.program_id(2) == 0)
    def _init():
        o_ref[...] = jnp.broadcast_to(b_ref[...], o_ref.shape).astype(o_ref.dtype)

    # Hot loop: MXU-only, f32 accumulation.
    o_ref[...] += jnp.dot(x_ref[...], w_ref[...], preferred_element_type=jnp.float32)


def prepare_linear_params(weight, bias, compute_dtype=jnp.float32):
    """One-time (init-time) parameter prep.

    weight: (C, D) torch nn.Linear layout; bias: (C,).
    Transposes + zero-pads W to a lane-dense (D_pad, C_pad) layout ONCE, so the
    per-call forward never pays an extra HBM pass over the weights.
    """
    C, D = weight.shape
    assert bias.shape == (C,)
    D_pad = _round_up(D, 128)
    C_pad = _round_up(C, 128)
    w_p = jnp.zeros((D_pad, C_pad), compute_dtype).at[:D, :C].set(
        weight.T.astype(compute_dtype)
    )
    b_p = jnp.zeros((1, C_pad), jnp.float32).at[0, :C].set(bias.astype(jnp.float32))
    return {"w": w_p, "b": b_p, "C": C, "D": D, "compute_dtype": compute_dtype}


def linear_classifier_forward(x, params):
    """y = x @ W^T + b with pre-prepared params. x: (B, D) -> (B, C) float32."""
    w_p, b_p = params["w"], params["b"]
    C, D = params["C"], params["D"]
    cdtype = params["compute_dtype"]
    B, Dx = x.shape
    assert Dx == D
    D_pad, C_pad = w_p.shape
    M_pad = _round_up(B, 8)
    itemsize = jnp.dtype(cdtype).itemsize

    # ---- tile selection (divisor-aware: never over-pads the padded dims) ----
    # Classifier regime: keep the whole activation resident in VMEM when small,
    # so the kernel becomes a pure W stream pinned at the HBM roofline.
    x_bytes = M_pad * D_pad * itemsize
    if x_bytes <= 8 * 1024 * 1024 and D_pad <= 4096:
        tm, tk = M_pad, D_pad
    else:
        tm = _largest_aligned_divisor(M_pad, 8, 512)
        tk = _largest_aligned_divisor(D_pad, 128, 1024)
    tn = _largest_aligned_divisor(C_pad, 128, 512)

    # v7x has 2 TensorCores: make sure the "parallel" sub-grid has >= 2 blocks
    # when the problem is large enough to split (no-op on v5e/v6e: 1 TC).
    if (M_pad // tm) * (C_pad // tn) == 1:
        if C_pad >= 2 * 128:
            tn = _largest_aligned_divisor(C_pad, 128, C_pad // 2)
        elif M_pad >= 2 * 8:
            tm = _largest_aligned_divisor(M_pad, 8, M_pad // 2)

    grid = (M_pad // tm, C_pad // tn, D_pad // tk)

    # ---- pad x only if actually needed (skip the extra HBM pass when aligned) ----
    x_c = x.astype(cdtype)
    if (B, D) != (M_pad, D_pad):
        x_c = jnp.zeros((M_pad, D_pad), cdtype).at[:B, :D].set(x_c)

    # ---- generation-aware VMEM budget: 2x the double-buffered tiles ----
    tile_bytes = (
        2 * itemsize * (tm * tk + tk * tn)  # double-buffered x / W tiles
        + 2 * 4 * tn                        # double-buffered bias tile (f32)
        + 2 * 4 * tm * tn                   # resident f32 output tile (double-buffered)
    )
    try:
        vmem_cap = int(pltpu.get_tpu_info().vmem_capacity_bytes)
    except Exception:
        vmem_cap = 64 * 1024 * 1024         # conservative fallback: v7x physical VMEM
    ceiling = min((vmem_cap * 3) // 4, 100 * 1024 * 1024)
    vmem_limit = int(min(max(2 * tile_bytes, 16 * 1024 * 1024), ceiling))

    # Truthful re-streaming accounting: x is read once per class tile, W once per
    # batch tile under this (i, j, k) tiling.
    cost = pl.CostEstimate(
        flops=2 * M_pad * D_pad * C_pad,
        transcendentals=0,
        bytes_accessed=(
            itemsize * M_pad * D_pad * (C_pad // tn)
            + itemsize * D_pad * C_pad * (M_pad // tm)
            + 4 * M_pad * C_pad
            + 4 * C_pad * (M_pad // tm)
        ),
    )

    out = pl.pallas_call(
        _linear_kernel,
        out_shape=jax.ShapeDtypeStruct((M_pad, C_pad), jnp.float32),
        grid=grid,
        in_specs=[
            # x tile: index ignores j, so it stays resident across the class axis
            # (and across the whole grid when tm=M_pad, tk=D_pad).
            pl.BlockSpec((tm, tk), lambda i, j, k: (i, k)),
            # W^T tile (pre-transposed/padded once at init time).
            pl.BlockSpec((tk, tn), lambda i, j, k: (k, j)),
            # Bias tile.
            pl.BlockSpec((1, tn), lambda i, j, k: (0, j)),
        ],
        out_specs=pl.BlockSpec((tm, tn), lambda i, j, k: (i, j)),
        compiler_params=pltpu.CompilerParams(
            dimension_semantics=("parallel", "parallel", "arbitrary"),
            vmem_limit_bytes=vmem_limit,
        ),
        cost_estimate=cost,
    )(x_c, w_p, b_p)

    # Slice only when padding was actually added.
    if (M_pad, C_pad) != (B, C):
        out = out[:B, :C]
    return out


def linear_classifier(x, weight, bias):
    """Convenience one-shot wrapper (prep + forward)."""
    return linear_classifier_forward(x, prepare_linear_params(weight, bias))


if __name__ == "__main__":
    # Small shapes consistent with the module: batch=8, input_size=32, num_classes=16.
    batch, input_size, num_classes = 8, 32, 16

    key = jax.random.PRNGKey(0)
    kx, kw, kb = jax.random.split(key, 3)

    x = jax.random.normal(kx, (batch, input_size), dtype=jnp.float32)

    # Deterministic parameter init mimicking nn.Linear (uniform in +/- 1/sqrt(in_features)).
    bound = 1.0 / jnp.sqrt(jnp.float32(input_size))
    w = jax.random.uniform(kw, (num_classes, input_size), jnp.float32, -bound, bound)
    b = jax.random.uniform(kb, (num_classes,), jnp.float32, -bound, bound)

    # One-time parameter prep (init-time), then a jitted forward closing over it.
    params = prepare_linear_params(w, b)          # f32: exact nn.Linear numerics
    fwd = jax.jit(lambda xx: linear_classifier_forward(xx, params))

    out = jax.block_until_ready(fwd(x))

    # Correctness check against the pure-JAX reference of x @ W^T + b.
    ref = x @ w.T + b
    assert out.shape == (batch, num_classes)
    assert jnp.allclose(out, ref, atol=1e-5, rtol=1e-5)

    print("KERNEL_OK")
</pallas_src>

<mosaic_0001>
module attributes {stable_mosaic.version = 11 : i64} {
  func.func @_linear_kernel(%arg0: i32, %arg1: i32, %arg2: i32, %arg3: memref<8x128xf32, #tpu.memory_space<vmem>>, %arg4: memref<128x128xf32, #tpu.memory_space<vmem>>, %arg5: memref<1x128xf32, #tpu.memory_space<vmem>>, %arg6: memref<8x128xf32, #tpu.memory_space<vmem>>) attributes {dimension_semantics = [#tpu.dimension_semantics<parallel>, #tpu.dimension_semantics<parallel>, #tpu.dimension_semantics<arbitrary>], iteration_bounds = array<i64: 1, 1, 1>, scalar_prefetch = 0 : i64, scratch_operands = 0 : i64, tpu.core_type = #tpu.core_type<tc>, window_params = [{transform_indices = @transform_0, window_bounds = array<i64: 8, 128>}, {transform_indices = @transform_1, window_bounds = array<i64: 128, 128>}, {transform_indices = @transform_2, window_bounds = array<i64: 1, 128>}, {transform_indices = @transform_3, window_bounds = array<i64: 8, 128>}]} {
    %c0_i32 = arith.constant 0 : i32
    %0 = arith.cmpi eq, %arg2, %c0_i32 : i32
    %1 = arith.extui %0 : i1 to i32
    %c0_i32_0 = arith.constant 0 : i32
    %2 = arith.cmpi ne, %1, %c0_i32_0 : i32
    scf.if %2 {
      %c0_8 = arith.constant 0 : index
      %c0_9 = arith.constant 0 : index
      %9 = vector.load %arg5[%c0_8, %c0_9] : memref<1x128xf32, #tpu.memory_space<vmem>>, vector<1x128xf32>
      %10 = vector.shape_cast %9 : vector<1x128xf32> to vector<1x128xf32>
      %11 = vector.broadcast %10 : vector<1x128xf32> to vector<8x128xf32>
      %c0_10 = arith.constant 0 : index
      %c0_11 = arith.constant 0 : index
      %12 = vector.load %arg6[%c0_10, %c0_11] : memref<8x128xf32, #tpu.memory_space<vmem>>, vector<8x128xf32>
      tpu.vector_store %arg6[%c0_10, %c0_11], %11 {strides = array<i32>} : memref<8x128xf32, #tpu.memory_space<vmem>>, vector<8x128xf32>,
    } else {
    }
    %c0 = arith.constant 0 : index
    %c0_1 = arith.constant 0 : index
    %3 = vector.load %arg6[%c0, %c0_1] : memref<8x128xf32, #tpu.memory_space<vmem>>, vector<8x128xf32>
    %c0_2 = arith.constant 0 : index
    %c0_3 = arith.constant 0 : index
    %4 = vector.load %arg3[%c0_2, %c0_3] : memref<8x128xf32, #tpu.memory_space<vmem>>, vector<8x128xf32>
    %c0_4 = arith.constant 0 : index
    %c0_5 = arith.constant 0 : index
    %5 = vector.load %arg4[%c0_4, %c0_5] : memref<128x128xf32, #tpu.memory_space<vmem>>, vector<128x128xf32>
    %cst = arith.constant dense<0.000000e+00> : vector<8x128xf32>
    %6 = tpu.matmul %4, %5, %cst {dimension_numbers = #tpu.dot_dimension_numbers<[1], [0], [0], [1], [0, 0, 1, 1], [], []>} : vector<8x128xf32>, vector<128x128xf32>, vector<8x128xf32> -> vector<8x128xf32>
    %7 = arith.addf %3, %6 : vector<8x128xf32>
    %c0_6 = arith.constant 0 : index
    %c0_7 = arith.constant 0 : index
    %8 = vector.load %arg6[%c0_6, %c0_7] : memref<8x128xf32, #tpu.memory_space<vmem>>, vector<8x128xf32>
    tpu.vector_store %arg6[%c0_6, %c0_7], %7 {strides = array<i32>} : memref<8x128xf32, #tpu.memory_space<vmem>>, vector<8x128xf32>,
    return
  }
  func.func @transform_0(%arg0: i32, %arg1: i32, %arg2: i32) -> (i32, i32) {
    %c0_i32 = arith.constant 0 : i32
    return %arg0, %arg2 : i32, i32
  }
  func.func @transform_1(%arg0: i32, %arg1: i32, %arg2: i32) -> (i32, i32) {
    %c0_i32 = arith.constant 0 : i32
    return %arg2, %arg1 : i32, i32
  }
  func.func @transform_2(%arg0: i32, %arg1: i32, %arg2: i32) -> (i32, i32) {
    %c0_i32 = arith.constant 0 : i32
    %c0_i32_0 = arith.constant 0 : i32
    return %c0_i32, %arg1 : i32, i32
  }
  func.func @transform_3(%arg0: i32, %arg1: i32, %arg2: i32) -> (i32, i32) {
    %c0_i32 = arith.constant 0 : i32
    return %arg0, %arg1 : i32, i32
  }
}

</mosaic_0001>

<bundles_post_ra>
// kernel: _lambda_.1
= control target key start
LH: loop header
LB: loop body
LE: loop exit
PB: predicated region body
PF: predicated region fallthrough
CT: control target
= control target key end

     0   :  { %8 = vsyncpa [#allocation3], 0  ;;  %s335_s0 = inlined_call_operand.vmem [shape: f32[8,128], index: 0, kind: input, shape index: {}]   ;;  %s336_s1 = inlined_call_operand.hbm [shape: f32[128,128], index: 1, kind: input, shape index: {}]   ;;  %s337_s2 = inlined_call_operand.vmem [shape: f32[1,128], index: 2, kind: input, shape index: {}]   ;;  %s338_s3 = inlined_call_operand.hbm [shape: f32[8,128], index: 3, kind: output, shape index: {}]  }
   0x1   :  { %9 = vsyncpa [#allocation4], 0  ;;  %s278_s12 = smov [#allocation2]   ;;  %s230_s16 = scalar_lea.hbm %s336_s1, 2048 }
   0x2   :  { %s17_s13 = sshll.u32 %s278_s12, 4  ;;  %p231_p0 = scmp.ne.s32.totalorder %s336_s1, %s230_s16  ;;  %s18_s13 = int_to_ptr.vmem [resolvable:$true] %s17_s13 }
   0x3   :  { %p234_p1 = scmp.lt.u32.totalorder %s230_s16, %s336_s1 }
   0x5   :  { %p236_p2 = pnand %p234_p1, %p231_p0 }
   0x7   :  { %239 = shalt.err (!%p236_p2)
}
   0x8   :  { %s240_s21 = scalar_lea.vmem %s18_s13, 2048  ;;  %p245_p4 = scmp.lt.s32.totalorder %s18_s13, %s18_s13 }
   0x9   :  { %p241_p3 = scmp.ne.s32.totalorder %s18_s13, %s240_s21  ;;  %p246_p5 = scmp.lt.s32.totalorder %s240_s21, %s240_s21 }
   0xb   :  { %p247_p6 = por %p246_p5, %p245_p4 }
   0xd   :  { %p248_p7 = pnand %p247_p6, %p241_p3 }
   0xf   :  { %251 = shalt.err (!%p248_p7)
}
  0x10   :  { %s279_s22 = smov 128   ;;  %s280_s23 = smov 8  }
  0x11   :  { %23 = dma.hbm_to_vmem [thread:$0]  %s336_s1, 2048, %s18_s13, [#allocation3], %s279_s22, %s279_s22, %s280_s23  }
  0x12   :  { %274 = dma.done.wait [#allocation3], 2048  }
  0x13   :  { %275 = vsyncadd [#allocation3], 4294965248  ;;  %v281_v0 = vmov 0.0|0.0   ;;  %vm282_vm0 = vmmov 0   ;;  %v283_v1 = vmov 0.0   ;;  %v43_v2 = vld [vmem:[#allocation2] sm:$0xff] }
  0x14   :  { %199 = vmatprep.subr.bf16.mxu0 %v281_v0  ;;  %196 = vmatprep.mubr.msk.f32.mxu0 %vm282_vm0, %v283_v1  ;;  %v44_v3 = vld [vmem:[#allocation2 + $0x8] sm:$0xff]  ;;  %v45_v4 = vld [vmem:[#allocation2 + $0x10] sm:$0xff]  ;;  %v46_v6 = vld [vmem:[#allocation2 + $0x18] sm:$0xff]  ;;  %s284_s29 = smov [#allocation5]  }
  0x15   :  { %v200_v5 = vpack.c.bf16 %v44_v3, %v43_v2  ;;  %v203_v7 = vpack.c.bf16 %v46_v6, %v45_v4  ;;  %v47_v8 = vld [vmem:[#allocation2 + $0x20] sm:$0xff]  ;;  %v48_v9 = vld [vmem:[#allocation2 + $0x28] sm:$0xff]  ;;  %v49_v11 = vld [vmem:[#allocation2 + $0x30] sm:$0xff]  ;;  %s137_s30 = sshll.u32 %s284_s29, 4  ;;  %s138_s30 = int_to_ptr.vmem [resolvable:$true] %s137_s30 }
  0x16   :  { %v206_v10 = vpack.c.bf16 %v48_v9, %v47_v8  ;;  %v50_v12 = vld [vmem:[#allocation2 + $0x38] sm:$0xff]  ;;  %v51_v14 = vld [vmem:[#allocation2 + $0x40] sm:$0xff]  ;;  %v52_v15 = vld [vmem:[#allocation2 + $0x48] sm:$0xff]  ;;  %s252_s4 = scalar_lea.vmem %s138_s30, 128  ;;  %p257_p9 = scmp.lt.s32.totalorder %s138_s30, %s138_s30 }
  0x17   :  { %201 = vmatpush3.bf16.msra.mxu0 %v200_v5  ;;  %v209_v13 = vpack.c.bf16 %v50_v12, %v49_v11  ;;  %v212_v16 = vpack.c.bf16 %v52_v15, %v51_v14  ;;  %v53_v17 = vld [vmem:[#allocation2 + $0x50] sm:$0xff]  ;;  %v54_v18 = vld [vmem:[#allocation2 + $0x58] sm:$0xff]  ;;  %v55_v20 = vld [vmem:[#allocation2 + $0x60] sm:$0xff]  ;;  %p253_p8 = scmp.ne.s32.totalorder %s138_s30, %s252_s4  ;;  %p258_p10 = scmp.lt.s32.totalorder %s252_s4, %s252_s4 }
  0x18   :  { %202 = vmatprep.subr.bf16.mxu0 %v281_v0  ;;  %v215_v19 = vpack.c.bf16 %v54_v18, %v53_v17  ;;  %v56_v21 = vld [vmem:[#allocation2 + $0x68] sm:$0xff]  ;;  %v57_v23 = vld [vmem:[#allocation2 + $0x70] sm:$0xff]  ;;  %v58_v24 = vld [vmem:[#allocation2 + $0x78] sm:$0xff] }
  0x19   :  { %v218_v22 = vpack.c.bf16 %v56_v21, %v55_v20  ;;  %v221_v25 = vpack.c.bf16 %v58_v24, %v57_v23  ;;  %v42_v26 = vld [vmem:[%s335_s0] sm:$0xff]  ;;  %p259_p11 = por %p258_p10, %p257_p9 }
  0x1a   :  { %v146_v27 = vld [vmem:[%s337_s2] ss:$0 sm:$0xff] }
  0x1b   :  { %204 = vmatpush3.bf16.msra.mxu0 %v203_v7  ;;  %p260_p12 = pnand %p259_p11, %p253_p8 }
  0x1c   :  { %205 = vmatprep.subr.bf16.mxu0 %v281_v0 }
  0x1f   :  { %207 = vmatpush3.bf16.msra.mxu0 %v206_v10 }
  0x20   :  { %208 = vmatprep.subr.bf16.mxu0 %v281_v0 }
  0x23   :  { %210 = vmatpush3.bf16.msra.mxu0 %v209_v13 }
  0x24   :  { %211 = vmatprep.subr.bf16.mxu0 %v281_v0 }
  0x27   :  { %213 = vmatpush3.bf16.msra.mxu0 %v212_v16 }
  0x28   :  { %214 = vmatprep.subr.bf16.mxu0 %v281_v0 }
  0x2b   :  { %216 = vmatpush3.bf16.msra.mxu0 %v215_v19 }
  0x2c   :  { %217 = vmatprep.subr.bf16.mxu0 %v281_v0 }
  0x2f   :  { %219 = vmatpush3.bf16.msra.mxu0 %v218_v22 }
  0x30   :  { %220 = vmatprep.subr.bf16.mxu0 %v281_v0 }
  0x33   :  { %222 = vmatpush3.bf16.msra.mxu0 %v221_v25 }
  0x36   :  { %197 = vmatmul.mubr.f32.vlgmr.msra.gmra.mrb[0].mxu0 %v42_v26 }
 0x109   :  { %v125_v28 = vpop.f32.mrb[0].mxu0 }
 0x10a   :  { %v129_v29 = vadd.f32 %v146_v27, %v125_v28  ;;  %v198_v30 = vpop.f32.mrb[1].mxu0 }
 0x10c   :  { %130 = vst [vmem:[#allocation5] sm:$0xff] %v129_v29 }
 0x10d   :  { %263 = shalt.err (!%p260_p12)
}
 0x10e   :  { %s264_s6 = scalar_lea.hbm %s338_s3, 128 }
 0x10f   :  { %p265_p13 = scmp.ne.s32.totalorder %s338_s3, %s264_s6  ;;  %p268_p0 = scmp.lt.u32.totalorder %s264_s6, %s338_s3 }
 0x111   :  { %p270_p1 = pnand %p268_p0, %p265_p13 }
 0x113   :  { %273 = shalt.err (!%p270_p1)
}
 0x114   :  { %140 = dma.vmem_to_hbm [thread:$0]  %s138_s30, 128, %s338_s3, [#allocation4]  }
 0x115   :  { %276 = dma.done.wait [#allocation4], 128  }
 0x116   :  { %277 = vsyncadd [#allocation4], 4294967168 }
 0x117   :  { %144 = vsyncpa [#allocation3], 1 }
 0x118   :  { %145 = vsyncpa [#allocation4], 1 }

</bundles_post_ra>
